<compile_context>
chip_gen: v6e
topology: v6e:2x2x1
jax: 0.10.0
libtpu: 0.0.40
codegen_flags: <defaults>
</compile_context>

<pallas_src>
import functools

import jax
import jax.numpy as jnp
from jax.experimental import pallas as pl
from jax.experimental.pallas import tpu as pltpu


def _cdiv(a, b):
    return -(-a // b)


def _round_up(n, m):
    return ((n + m - 1) // m) * m


def _dqn_kernel(x_ref, w1_ref, b1_ref, w2_ref, b2_ref, w3_ref, b3_ref,
                a1_ref, a2_ref, o_ref, *, compute_dtype):
    """Whole 3-layer MLP forward for one batch tile, fused in VMEM.

    Layer 1 runs in f32 (K = n_obs is tiny, so it is free on the MXU and keeps
    full input precision).  Layers 2/3 run with `compute_dtype` MXU inputs and
    f32 accumulation.  PReLU slopes are read from SMEM on the scalar unit.
    """
    a1 = a1_ref[0]
    a2 = a2_ref[0]

    # layer1 + PReLU_1  (f32 matmul, K is tiny)
    h = jnp.dot(x_ref[...], w1_ref[...],
                preferred_element_type=jnp.float32) + b1_ref[...]
    h = jnp.where(h > 0, h, a1 * h)

    # layer2 + PReLU_2  (compute_dtype MXU inputs, f32 accumulation)
    h = jnp.dot(h.astype(compute_dtype), w2_ref[...].astype(compute_dtype),
                preferred_element_type=jnp.float32) + b2_ref[...]
    h = jnp.where(h > 0, h, a2 * h)

    # layer3 (no activation)
    o_ref[...] = (jnp.dot(h.astype(compute_dtype),
                          w3_ref[...].astype(compute_dtype),
                          preferred_element_type=jnp.float32)
                  + b3_ref[...]).astype(o_ref.dtype)


def dqn_forward(x, params, *, batch_tile=1024, compute_dtype=jnp.bfloat16,
                small_batch_threshold=64):
    """x: (B, n_observations) f32.  Returns (B, n_actions) f32."""
    w1, b1, a1, w2, b2, a2, w3, b3 = params
    B, n_obs = x.shape
    hidden = w1.shape[1]
    n_act = w3.shape[1]

    # Tiny batches: a single fused XLA dot chain beats any pallas_call launch
    # (pad + kernel + slice overhead dominates at this size).
    if B <= small_batch_threshold:
        h = x @ w1 + b1
        h = jnp.where(h > 0, h, a1[0, 0] * h)
        h = h @ w2 + b2
        h = jnp.where(h > 0, h, a2[0, 0] * h)
        return h @ w3 + b3

    # Balanced batch tiling: pick the number of grid steps first, then size the
    # tile to the batch (multiple of 16 rows for bf16 sublane packing).  Force
    # an even number of steps for larger batches so both v7x TensorCores get
    # work under dimension_semantics=("parallel",).
    num_tiles = max(1, _cdiv(B, batch_tile))
    if B >= 128 and num_tiles % 2:
        num_tiles += 1
    tile = _round_up(_cdiv(B, num_tiles), 16)
    B_pad = tile * num_tiles
    if B_pad != B:
        x = jnp.pad(x, ((0, B_pad - B), (0, 0)))

    a1s = a1.reshape((1,)).astype(jnp.float32)
    a2s = a2.reshape((1,)).astype(jnp.float32)

    rep = lambda i: (0, 0)                       # replicated (constant block idx)
    smem_spec = pl.BlockSpec(memory_space=pltpu.MemorySpace.SMEM)

    flops = 2 * B_pad * (n_obs * hidden + hidden * hidden + hidden * n_act)
    weight_bytes = 4 * (n_obs * hidden + hidden * hidden + hidden * n_act
                        + 2 * hidden + n_act)
    bytes_accessed = 4 * B_pad * (n_obs + n_act) + weight_bytes

    kernel = functools.partial(_dqn_kernel, compute_dtype=compute_dtype)

    out = pl.pallas_call(
        kernel,
        out_shape=jax.ShapeDtypeStruct((B_pad, n_act), jnp.float32),
        grid_spec=pltpu.PrefetchScalarGridSpec(
            num_scalar_prefetch=0,
            grid=(num_tiles,),
            in_specs=[
                pl.BlockSpec((tile, n_obs), lambda i: (i, 0)),   # x tile
                pl.BlockSpec((n_obs, hidden), rep),              # W1
                pl.BlockSpec((1, hidden), rep),                  # b1
                pl.BlockSpec((hidden, hidden), rep),             # W2
                pl.BlockSpec((1, hidden), rep),                  # b2
                pl.BlockSpec((hidden, n_act), rep),              # W3
                pl.BlockSpec((1, n_act), rep),                   # b3
                smem_spec,                                       # PReLU slope 1
                smem_spec,                                       # PReLU slope 2
            ],
            out_specs=pl.BlockSpec((tile, n_act), lambda i: (i, 0)),
        ),
        compiler_params=pltpu.CompilerParams(
            dimension_semantics=("parallel",)),
        cost_estimate=pl.CostEstimate(
            flops=flops, transcendentals=0, bytes_accessed=bytes_accessed),
    )(x, w1, b1, w2, b2, w3, b3, a1s, a2s)

    return out[:B] if B_pad != B else out


def init_dqn_params(key, n_observations, n_actions, hidden=128):
    """Deterministic init mimicking PyTorch defaults (uniform +/- 1/sqrt(fan_in));
    PReLU slopes init to 0.25. Weights stored as (in, out)."""
    ks = jax.random.split(key, 6)

    def linear(kw, kb, fan_in, fan_out):
        bound = 1.0 / jnp.sqrt(jnp.float32(fan_in))
        w = jax.random.uniform(kw, (fan_in, fan_out), jnp.float32, -bound, bound)
        b = jax.random.uniform(kb, (1, fan_out), jnp.float32, -bound, bound)
        return w, b

    w1, b1 = linear(ks[0], ks[1], n_observations, hidden)
    w2, b2 = linear(ks[2], ks[3], hidden, hidden)
    w3, b3 = linear(ks[4], ks[5], hidden, n_actions)
    a1 = jnp.full((1, 1), 0.25, jnp.float32)
    a2 = jnp.full((1, 1), 0.25, jnp.float32)
    return (w1, b1, a1, w2, b2, a2, w3, b3)


def dqn_reference(x, params):
    """Pure-JAX fp32 reference of the PyTorch forward."""
    w1, b1, a1, w2, b2, a2, w3, b3 = params
    h = x @ w1 + b1
    h = jnp.where(h > 0, h, a1[0, 0] * h)
    h = h @ w2 + b2
    h = jnp.where(h > 0, h, a2[0, 0] * h)
    return h @ w3 + b3


if __name__ == "__main__":
    n_observations, n_actions = 4, 8

    key = jax.random.PRNGKey(0)
    kx, kp, kx2 = jax.random.split(key, 3)
    params = init_dqn_params(kp, n_observations, n_actions)

    # Small batch (spec-scale use case, hits the jnp fast path) and a larger
    # batch that exercises balanced tiling (300 -> 2 tiles of 160, B_pad=320)
    # plus the forced-pallas small-batch path for kernel coverage.
    x_small = jax.random.normal(kx, (2, n_observations), jnp.float32)
    x_big = jax.random.normal(kx2, (300, n_observations), jnp.float32)

    fwd_bf16 = jax.jit(dqn_forward)
    fwd_f32 = jax.jit(functools.partial(dqn_forward, compute_dtype=jnp.float32))
    fwd_small_pallas = jax.jit(
        functools.partial(dqn_forward, small_batch_threshold=0))

    # --- big batch: Pallas path (bf16 and f32 validation) ---
    ref_big = dqn_reference(x_big, params)

    out_bf = jax.block_until_ready(fwd_bf16(x_big, params))
    assert out_bf.shape == ref_big.shape
    assert jnp.allclose(out_bf, ref_big, atol=3e-2, rtol=5e-2), "bf16 mismatch"

    out_32 = jax.block_until_ready(fwd_f32(x_big, params))
    assert out_32.shape == ref_big.shape
    assert jnp.allclose(out_32, ref_big, atol=1e-5, rtol=1e-5), "f32 mismatch"

    # --- small batch: jnp fast path and forced Pallas path ---
    ref_small = dqn_reference(x_small, params)

    out_small = jax.block_until_ready(fwd_bf16(x_small, params))
    assert out_small.shape == ref_small.shape
    assert jnp.allclose(out_small, ref_small, atol=1e-5, rtol=1e-5), \
        "small-batch fast-path mismatch"

    out_small_k = jax.block_until_ready(fwd_small_pallas(x_small, params))
    assert out_small_k.shape == ref_small.shape
    assert jnp.allclose(out_small_k, ref_small, atol=3e-2, rtol=5e-2), \
        "small-batch pallas mismatch"

    print("KERNEL_OK")
</pallas_src>

<mosaic_0001>
module attributes {stable_mosaic.version = 11 : i64} {
  func.func @_dqn_kernel(%arg0: i32, %arg1: memref<160x4xf32, #tpu.memory_space<vmem>>, %arg2: memref<4x128xf32, #tpu.memory_space<vmem>>, %arg3: memref<1x128xf32, #tpu.memory_space<vmem>>, %arg4: memref<128x128xf32, #tpu.memory_space<vmem>>, %arg5: memref<1x128xf32, #tpu.memory_space<vmem>>, %arg6: memref<128x8xf32, #tpu.memory_space<vmem>>, %arg7: memref<1x8xf32, #tpu.memory_space<vmem>>, %arg8: memref<1xf32, #tpu.memory_space<smem>>, %arg9: memref<1xf32, #tpu.memory_space<smem>>, %arg10: memref<160x8xf32, #tpu.memory_space<vmem>>) attributes {dimension_semantics = [#tpu.dimension_semantics<parallel>], iteration_bounds = array<i64: 2>, scalar_prefetch = 0 : i64, scratch_operands = 0 : i64, tpu.core_type = #tpu.core_type<tc>, window_params = [{transform_indices = @transform_0, window_bounds = array<i64: 160, 4>}, {pipeline_mode = #tpu.pipeline_mode<synchronous>, transform_indices = @transform_1, window_bounds = array<i64: 4, 128>}, {pipeline_mode = #tpu.pipeline_mode<synchronous>, transform_indices = @transform_2, window_bounds = array<i64: 1, 128>}, {pipeline_mode = #tpu.pipeline_mode<synchronous>, transform_indices = @transform_3, window_bounds = array<i64: 128, 128>}, {pipeline_mode = #tpu.pipeline_mode<synchronous>, transform_indices = @transform_4, window_bounds = array<i64: 1, 128>}, {pipeline_mode = #tpu.pipeline_mode<synchronous>, transform_indices = @transform_5, window_bounds = array<i64: 128, 8>}, {pipeline_mode = #tpu.pipeline_mode<synchronous>, transform_indices = @transform_6, window_bounds = array<i64: 1, 8>}, {transform_indices = @transform_7, window_bounds = array<i64: 1>}, {transform_indices = @transform_8, window_bounds = array<i64: 1>}, {transform_indices = @transform_9, window_bounds = array<i64: 160, 8>}]} {
    %c0 = arith.constant 0 : index
    %0 = memref.load %arg8[%c0] : memref<1xf32, #tpu.memory_space<smem>>
    %c0_0 = arith.constant 0 : index
    %1 = memref.load %arg9[%c0_0] : memref<1xf32, #tpu.memory_space<smem>>
    %c0_1 = arith.constant 0 : index
    %c0_2 = arith.constant 0 : index
    %2 = vector.load %arg1[%c0_1, %c0_2] : memref<160x4xf32, #tpu.memory_space<vmem>>, vector<160x4xf32>
    %c0_3 = arith.constant 0 : index
    %c0_4 = arith.constant 0 : index
    %3 = vector.load %arg2[%c0_3, %c0_4] : memref<4x128xf32, #tpu.memory_space<vmem>>, vector<4x128xf32>
    %cst = arith.constant dense<0.000000e+00> : vector<160x128xf32>
    %4 = tpu.matmul %2, %3, %cst {dimension_numbers = #tpu.dot_dimension_numbers<[1], [0], [0], [1], [0, 0, 1, 1], [], []>} : vector<160x4xf32>, vector<4x128xf32>, vector<160x128xf32> -> vector<160x128xf32>
    %c0_5 = arith.constant 0 : index
    %c0_6 = arith.constant 0 : index
    %5 = vector.load %arg3[%c0_5, %c0_6] : memref<1x128xf32, #tpu.memory_space<vmem>>, vector<1x128xf32>
    %6 = vector.broadcast %5 : vector<1x128xf32> to vector<160x128xf32>
    %7 = arith.addf %4, %6 : vector<160x128xf32>
    %cst_7 = arith.constant 0.000000e+00 : f32
    %8 = vector.broadcast %cst_7 : f32 to vector<160x128xf32>
    %9 = arith.cmpf ogt, %7, %8 : vector<160x128xf32>
    %10 = vector.broadcast %0 : f32 to vector<160x128xf32>
    %11 = arith.mulf %10, %7 : vector<160x128xf32>
    %12 = arith.select %9, %7, %11 : vector<160x128xi1>, vector<160x128xf32>
    %13 = arith.truncf %12 : vector<160x128xf32> to vector<160x128xbf16>
    %c0_8 = arith.constant 0 : index
    %c0_9 = arith.constant 0 : index
    %14 = vector.load %arg4[%c0_8, %c0_9] : memref<128x128xf32, #tpu.memory_space<vmem>>, vector<128x128xf32>
    %15 = arith.truncf %14 : vector<128x128xf32> to vector<128x128xbf16>
    %cst_10 = arith.constant dense<0.000000e+00> : vector<160x128xf32>
    %16 = tpu.matmul %13, %15, %cst_10 {dimension_numbers = #tpu.dot_dimension_numbers<[1], [0], [0], [1], [0, 0, 1, 1], [], []>} : vector<160x128xbf16>, vector<128x128xbf16>, vector<160x128xf32> -> vector<160x128xf32>
    %c0_11 = arith.constant 0 : index
    %c0_12 = arith.constant 0 : index
    %17 = vector.load %arg5[%c0_11, %c0_12] : memref<1x128xf32, #tpu.memory_space<vmem>>, vector<1x128xf32>
    %18 = vector.broadcast %17 : vector<1x128xf32> to vector<160x128xf32>
    %19 = arith.addf %16, %18 : vector<160x128xf32>
    %cst_13 = arith.constant 0.000000e+00 : f32
    %20 = vector.broadcast %cst_13 : f32 to vector<160x128xf32>
    %21 = arith.cmpf ogt, %19, %20 : vector<160x128xf32>
    %22 = vector.broadcast %1 : f32 to vector<160x128xf32>
    %23 = arith.mulf %22, %19 : vector<160x128xf32>
    %24 = arith.select %21, %19, %23 : vector<160x128xi1>, vector<160x128xf32>
    %25 = arith.truncf %24 : vector<160x128xf32> to vector<160x128xbf16>
    %c0_14 = arith.constant 0 : index
    %c0_15 = arith.constant 0 : index
    %26 = vector.load %arg6[%c0_14, %c0_15] : memref<128x8xf32, #tpu.memory_space<vmem>>, vector<128x8xf32>
    %27 = arith.truncf %26 : vector<128x8xf32> to vector<128x8xbf16>
    %cst_16 = arith.constant dense<0.000000e+00> : vector<160x8xf32>
    %28 = tpu.matmul %25, %27, %cst_16 {dimension_numbers = #tpu.dot_dimension_numbers<[1], [0], [0], [1], [0, 0, 1, 1], [], []>} : vector<160x128xbf16>, vector<128x8xbf16>, vector<160x8xf32> -> vector<160x8xf32>
    %c0_17 = arith.constant 0 : index
    %c0_18 = arith.constant 0 : index
    %29 = vector.load %arg7[%c0_17, %c0_18] : memref<1x8xf32, #tpu.memory_space<vmem>>, vector<1x8xf32>
    %30 = vector.broadcast %29 : vector<1x8xf32> to vector<160x8xf32>
    %31 = arith.addf %28, %30 : vector<160x8xf32>
    %c0_19 = arith.constant 0 : index
    %c0_20 = arith.constant 0 : index
    %32 = vector.load %arg10[%c0_19, %c0_20] : memref<160x8xf32, #tpu.memory_space<vmem>>, vector<160x8xf32>
    tpu.vector_store %arg10[%c0_19, %c0_20], %31 {strides = array<i32>} : memref<160x8xf32, #tpu.memory_space<vmem>>, vector<160x8xf32>,
    return
  }
  func.func @transform_0(%arg0: i32) -> (i32, i32) {
    %c0_i32 = arith.constant 0 : i32
    %c0_i32_0 = arith.constant 0 : i32
    return %arg0, %c0_i32 : i32, i32
  }
  func.func @transform_1(%arg0: i32) -> (i32, i32) {
    %c0_i32 = arith.constant 0 : i32
    %c0_i32_0 = arith.constant 0 : i32
    %c0_i32_1 = arith.constant 0 : i32
    return %c0_i32, %c0_i32_0 : i32, i32
  }
  func.func @transform_2(%arg0: i32) -> (i32, i32) {
    %c0_i32 = arith.constant 0 : i32
    %c0_i32_0 = arith.constant 0 : i32
    %c0_i32_1 = arith.constant 0 : i32
    return %c0_i32, %c0_i32_0 : i32, i32
  }
  func.func @transform_3(%arg0: i32) -> (i32, i32) {
    %c0_i32 = arith.constant 0 : i32
    %c0_i32_0 = arith.constant 0 : i32
    %c0_i32_1 = arith.constant 0 : i32
    return %c0_i32, %c0_i32_0 : i32, i32
  }
  func.func @transform_4(%arg0: i32) -> (i32, i32) {
    %c0_i32 = arith.constant 0 : i32
    %c0_i32_0 = arith.constant 0 : i32
    %c0_i32_1 = arith.constant 0 : i32
    return %c0_i32, %c0_i32_0 : i32, i32
  }
  func.func @transform_5(%arg0: i32) -> (i32, i32) {
    %c0_i32 = arith.constant 0 : i32
    %c0_i32_0 = arith.constant 0 : i32
    %c0_i32_1 = arith.constant 0 : i32
    return %c0_i32, %c0_i32_0 : i32, i32
  }
  func.func @transform_6(%arg0: i32) -> (i32, i32) {
    %c0_i32 = arith.constant 0 : i32
    %c0_i32_0 = arith.constant 0 : i32
    %c0_i32_1 = arith.constant 0 : i32
    return %c0_i32, %c0_i32_0 : i32, i32
  }
  func.func @transform_7(%arg0: i32) -> i32 {
    %c0_i32 = arith.constant 0 : i32
    %c0_i32_0 = arith.constant 0 : i32
    return %c0_i32 : i32
  }
  func.func @transform_8(%arg0: i32) -> i32 {
    %c0_i32 = arith.constant 0 : i32
    %c0_i32_0 = arith.constant 0 : i32
    return %c0_i32 : i32
  }
  func.func @transform_9(%arg0: i32) -> (i32, i32) {
    %c0_i32 = arith.constant 0 : i32
    %c0_i32_0 = arith.constant 0 : i32
    return %arg0, %c0_i32 : i32, i32
  }
}

</mosaic_0001>

<bundles_post_ra>
// kernel: dqn_forward.1
= control target key start
LH: loop header
LB: loop body
LE: loop exit
PB: predicated region body
PF: predicated region fallthrough
CT: control target
= control target key end

     0   :  { %s1374_s13 = smov 0   ;;  %s1679_s0 = inlined_call_operand.vmem [shape: f32[320,4], index: 0, kind: input, shape index: {}]   ;;  %s1680_s1 = inlined_call_operand.vmem [shape: f32[4,128], index: 1, kind: input, shape index: {}]   ;;  %s1681_s2 = inlined_call_operand.vmem [shape: f32[1,128], index: 2, kind: input, shape index: {}]   ;;  %s1682_s3 = inlined_call_operand.vmem [shape: f32[128,128], index: 3, kind: input, shape index: {}]   ;;  %s1683_s4 = inlined_call_operand.vmem [shape: f32[1,128], index: 4, kind: input, shape index: {}]   ;;  %s1684_s5 = inlined_call_operand.vmem [shape: f32[128,8], index: 5, kind: input, shape index: {}]   ;;  %s1685_s6 = inlined_call_operand.vmem [shape: f32[1,8], index: 6, kind: input, shape index: {}]   ;;  %s1686_s7 = inlined_call_operand.<no memory space> [shape: f32[1], index: 7, kind: input, shape index: {}]   ;;  %s1687_s8 = inlined_call_operand.<no memory space> [shape: f32[1], index: 8, kind: input, shape index: {}]   ;;  %s1688_s9 = inlined_call_operand.vmem [shape: f32[320,8], index: 9, kind: output, shape index: {}]  }
   0x1   :  { %14 = sst [smem:[#allocation2]] %s1686_s7 }
   0x2   :  { %15 = sst [smem:[#allocation3]] %s1687_s8 }
   0x3 LB: > { %s1106_s14 = sadd.s32 4294967295, %s1316_s13   ;;  %p1110_p0 = scmp.ge.s32.totalorder %s1316_s13, 1  ;;  %s1316_s13 = sphi %s1374_s13, %s21_s13  }
   0x4   : > { %p290_p1 = scmp.lt.s32.totalorder %s1316_s13, 3 }
   0x6   : > { %p291_p2 = pnand %p1110_p0, %p290_p1 }
   0x7   : > { %s326_s8 = smul.u32 (!%p291_p2), 20, %s1106_s14  ;;  %s339_s11 = sld [smem:[#allocation2]] (!%p291_p2) }
   0x8   : > { %294 = sbr.rel (%p291_p2) target bundleno = 665 (0x299), region = 56  ;;  %s340_s28 = sld [smem:[#allocation3]] (!%p291_p2) }
   0x9   : > { %p327_p3 = scmp.lt.s32.totalorder (!%p291_p2), %s326_s8, 39 }
   0xd   : > { %v361_v0 = vld [vmem:[%s1680_s1] sm:$0xf]  ;;  %vm430_vm0 = vcmask 1043456   ;;  %v684_v1 = vld [vmem:[%s1682_s3 + $0x70] sm:$0xff]  ;;  %v685_v2 = vld [vmem:[%s1682_s3 + $0x78] sm:$0xff]  ;;  %s1690_s8 = smov (!%p327_p3, %s326_s8), 39  ;;  %v1518_v62 = vstv %s339_s11 }
   0xe   : > { %1196 = vmatprep.subr.msk.mxu0 %vm430_vm0, %v361_v0  ;;  %1300 = vmatprep.subr.msk.mxu1 %vm430_vm0, %v361_v0  ;;  %v693_v3 = vpack.c.bf16 %v685_v2, %v684_v1  ;;  %s1111_s20 = sshll.u32 %s1690_s8, 3  ;;  %vm369_vm1 = vcmask 31744   ;;  %v682_v7 = vld [vmem:[%s1682_s3 + $0x60] sm:$0xff]  ;;  %v683_v8 = vld [vmem:[%s1682_s3 + $0x68] sm:$0xff]  ;;  %v680_v15 = vld [vmem:[%s1682_s3 + $0x50] sm:$0xff] }
   0xf   : > { %1197 = vmatpush3.msk.msra.mxu0 %vm430_vm0, %v361_v0  ;;  %1301 = vmatpush3.msk.msra.mxu1 %vm430_vm0, %v361_v0  ;;  %s1399_s23 = scalar_lea.vmem %s1679_s0, %s1111_s20  ;;  %v692_v13 = vpack.c.bf16 %v683_v8, %v682_v7  ;;  %v681_v16 = vld [vmem:[%s1682_s3 + $0x58] sm:$0xff]  ;;  %v678_v21 = vld [vmem:[%s1682_s3 + $0x40] sm:$0xff]  ;;  %v679_v22 = vld [vmem:[%s1682_s3 + $0x48] sm:$0xff]  ;;  %s1634_s14 = scalar_lea.vmem %s1688_s9, %s1111_s20 }
  0x10   : > { %1228 = vmatprep.subr.bf16.mxu1 %v693_v3  ;;  %v341_v4 = vld [vmem:[%s1399_s23] sm:$0xff]  ;;  %v342_v5 = vld [vmem:[%s1399_s23 + $0x8] sm:$0xff]  ;;  %v343_v6 = vld [vmem:[%s1399_s23 + $0x10] sm:$0xff]  ;;  %v691_v20 = vpack.c.bf16 %v681_v16, %v680_v15  ;;  %v690_v25 = vpack.c.bf16 %v679_v22, %v678_v21 }
  0x11   : > { %1198 = vmatprep.mubr.msk.f32.mxu0 %vm369_vm1, %v341_v4  ;;  %v344_v9 = vld [vmem:[%s1399_s23 + $0x18] sm:$0xff]  ;;  %v345_v10 = vld [vmem:[%s1399_s23 + $0x20] sm:$0xff]  ;;  %v358_v12 = vld [vmem:[%s1399_s23 + $0x88] sm:$0xff] }
  0x12   : > { %1199 = vmatmul.mubr.msk.f32.vlgmr.msra.gmra.mxu0 %vm369_vm1, %v342_v5  ;;  %v357_v11 = vld [vmem:[%s1399_s23 + $0x80] sm:$0xff]  ;;  %v359_v14 = vld [vmem:[%s1399_s23 + $0x90] sm:$0xff]  ;;  %v346_v17 = vld [vmem:[%s1399_s23 + $0x28] sm:$0xff] }
  0x13   : > { %1201 = vmatprep.mubr.msk.f32.mxu0 %vm369_vm1, %v343_v6  ;;  %1222 = vmatprep.mubr.msk.f32.mxu1 %vm369_vm1, %v357_v11  ;;  %v347_v18 = vld [vmem:[%s1399_s23 + $0x30] sm:$0xff]  ;;  %v360_v19 = vld [vmem:[%s1399_s23 + $0x98] sm:$0xff]  ;;  %v349_v24 = vld [vmem:[%s1399_s23 + $0x40] sm:$0xff] }
  0x14   : > { %1223 = vmatmul.mubr.msk.f32.vlgmr.msra.gmra.mxu1 %vm369_vm1, %v358_v12  ;;  %v348_v23 = vld [vmem:[%s1399_s23 + $0x38] sm:$0xff]  ;;  %v676_v26 = vld [vmem:[%s1682_s3 + $0x30] sm:$0xff]  ;;  %v350_v28 = vld [vmem:[%s1399_s23 + $0x48] sm:$0xff] }
  0x15   : > { %1225 = vmatprep.mubr.msk.f32.mxu1 %vm369_vm1, %v359_v14  ;;  %1229 = vmatpush3.bf16.msra.mxu1 %v693_v3  ;;  %v677_v27 = vld [vmem:[%s1682_s3 + $0x38] sm:$0xff]  ;;  %v351_v29 = vld [vmem:[%s1399_s23 + $0x50] sm:$0xff]  ;;  %v353_v32 = vld [vmem:[%s1399_s23 + $0x60] sm:$0xff] }
  0x16   : > { %1202 = vmatmul.mubr.msk.f32.gmra.mxu0 %vm369_vm1, %v344_v9  ;;  %1230 = vmatprep.subr.bf16.mxu1 %v692_v13  ;;  %v689_v30 = vpack.c.bf16 %v677_v27, %v676_v26  ;;  %v352_v31 = vld [vmem:[%s1399_s23 + $0x58] sm:$0xff]  ;;  %v354_v33 = vld [vmem:[%s1399_s23 + $0x68] sm:$0xff]  ;;  %v355_v34 = vld [vmem:[%s1399_s23 + $0x70] sm:$0xff] }
  0x17   : > { %1204 = vmatprep.mubr.msk.f32.mxu0 %vm369_vm1, %v345_v10  ;;  %v356_v35 = vld [vmem:[%s1399_s23 + $0x78] sm:$0xff]  ;;  %v674_v36 = vld [vmem:[%s1682_s3 + $0x20] sm:$0xff]  ;;  %v675_v37 = vld [vmem:[%s1682_s3 + $0x28] sm:$0xff] }
  0x18   : > { %1226 = vmatmul.mubr.msk.f32.gmra.mxu1 %vm369_vm1, %v360_v19  ;;  %v688_v38 = vpack.c.bf16 %v675_v37, %v674_v36  ;;  %v672_v39 = vld [vmem:[%s1682_s3 + $0x10] sm:$0xff]  ;;  %v673_v40 = vld [vmem:[%s1682_s3 + $0x18] sm:$0xff]  ;;  %v670_v42 = vld [vmem:[%s1682_s3] sm:$0xff] }
  0x19   : > { %1231 = vmatpush3.bf16.msra.mxu1 %v692_v13  ;;  %v687_v41 = vpack.c.bf16 %v673_v40, %v672_v39  ;;  %v671_v43 = vld [vmem:[%s1682_s3 + $0x8] sm:$0xff]  ;;  %v899_v45 = vld [vmem:[%s1684_s5 + $0x70] sm:$0xff]  ;;  %v900_v46 = vld [vmem:[%s1684_s5 + $0x78] sm:$0xff] }
  0x1a   : > { %1205 = vmatmul.mubr.msk.f32.gmra.mxu0 %vm369_vm1, %v346_v17  ;;  %1232 = vmatprep.subr.bf16.mxu1 %v691_v20  ;;  %v686_v44 = vpack.c.bf16 %v671_v43, %v670_v42  ;;  %v897_v47 = vld [vmem:[%s1684_s5 + $0x60] sm:$0xff]  ;;  %v908_v48 = vpack.c.bf16 %v900_v46, %v899_v45  ;;  %v898_v49 = vld [vmem:[%s1684_s5 + $0x68] sm:$0xff]  ;;  %v895_v51 = vld [vmem:[%s1684_s5 + $0x50] sm:$0xff] }
  0x1b   : > { %1207 = vmatprep.mubr.msk.f32.mxu0 %vm369_vm1, %v347_v18  ;;  %v907_v50 = vpack.c.bf16 %v898_v49, %v897_v47  ;;  %v896_v52 = vld [vmem:[%s1684_s5 + $0x58] sm:$0xff]  ;;  %v893_v54 = vld [vmem:[%s1684_s5 + $0x40] sm:$0xff]  ;;  %v894_v55 = vld [vmem:[%s1684_s5 + $0x48] sm:$0xff] }
  0x1c   : > { %1264 = vmatprep.subr.bf16.mxu0 %v908_v48  ;;  %v906_v53 = vpack.c.bf16 %v896_v52, %v895_v51  ;;  %v905_v56 = vpack.c.bf16 %v894_v55, %v893_v54  ;;  %v891_v57 = vld [vmem:[%s1684_s5 + $0x30] sm:$0xff]  ;;  %v892_v58 = vld [vmem:[%s1684_s5 + $0x38] sm:$0xff]  ;;  %v1516_v60 = vld [vmem:[%s1681_s2] ss:$0 sm:$0xff] }
  0x1d   : > { %1233 = vmatpush3.bf16.msra.mxu1 %v691_v20  ;;  %1265 = vmatpush3.bf16.msra.mxu0 %v908_v48  ;;  %v904_v59 = vpack.c.bf16 %v892_v58, %v891_v57 }
  0x1e   : > { %1208 = vmatmul.mubr.msk.f32.gmra.mxu0 %vm369_vm1, %v348_v23  ;;  %1234 = vmatprep.subr.bf16.mxu1 %v690_v25 }
  0x1f   : > { %1210 = vmatprep.mubr.msk.f32.mxu0 %vm369_vm1, %v349_v24  ;;  %1266 = vmatprep.subr.bf16.mxu0 %v907_v50 }
  0x21   : > { %1235 = vmatpush3.bf16.msra.mxu1 %v690_v25  ;;  %1267 = vmatpush3.bf16.msra.mxu0 %v907_v50 }
  0x22   : > { %1211 = vmatmul.mubr.msk.f32.gmra.mxu0 %vm369_vm1, %v350_v28  ;;  %1236 = vmatprep.subr.bf16.mxu1 %v689_v30 }
  0x23   : > { %1213 = vmatprep.mubr.msk.f32.mxu0 %vm369_vm1, %v351_v29  ;;  %1268 = vmatprep.subr.bf16.mxu0 %v906_v53 }
  0x25   : > { %1237 = vmatpush3.bf16.msra.mxu1 %v689_v30  ;;  %1269 = vmatpush3.bf16.msra.mxu0 %v906_v53 }
  0x26   : > { %1214 = vmatmul.mubr.msk.f32.gmra.mxu0 %vm369_vm1, %v352_v31  ;;  %1238 = vmatprep.subr.bf16.mxu1 %v688_v38 }
  0x27   : > { %1216 = vmatprep.mubr.msk.f32.mxu0 %vm369_vm1, %v353_v32  ;;  %1270 = vmatprep.subr.bf16.mxu0 %v905_v56 }
  0x29   : > { %1239 = vmatpush3.bf16.msra.mxu1 %v688_v38  ;;  %1271 = vmatpush3.bf16.msra.mxu0 %v905_v56 }
  0x2a   : > { %1217 = vmatmul.mubr.msk.f32.gmra.mxu0 %vm369_vm1, %v354_v33  ;;  %1240 = vmatprep.subr.bf16.mxu1 %v687_v41 }
  0x2b   : > { %1219 = vmatprep.mubr.msk.f32.mxu0 %vm369_vm1, %v355_v34  ;;  %1272 = vmatprep.subr.bf16.mxu0 %v904_v59 }
  0x2d   : > { %1241 = vmatpush3.bf16.msra.mxu1 %v687_v41  ;;  %1273 = vmatpush3.bf16.msra.mxu0 %v904_v59 }
  0x2e   : > { %1220 = vmatmul.mubr.msk.f32.gmra.mxu0 %vm369_vm1, %v356_v35  ;;  %1242 = vmatprep.subr.bf16.mxu1 %v686_v44 }
  0x31   : > { %1243 = vmatpush3.bf16.msra.mxu1 %v686_v44 }
  0xd2   : > { %v1200_v61 = vpop.f32.mrf.mxu0 }
  0xd3   : > { %v506_v63 = vadd.f32 %v1200_v61, %v1516_v60 }
  0xd4   : > { %v500_v0 = vpop.f32.mrf.mxu0  ;;  %v1224_v33 = vpop.f32.mrf.mxu1 }
  0xd5   : > { %v621_v1 = vmul.f32 %v1518_v62, %v506_v63  ;;  %v501_v2 = vadd.f32 %v1516_v60, %v500_v0  ;;  %vm600_vm2 = vcmp.gt.f32.partialorder %v506_v63, 0.0  ;;  %v586_v45 = vadd.f32 %v1224_v33, %v1516_v60 }
  0xd6   : > { %v1203_v3 = vpop.f32.mrf.mxu0  ;;  %v580_v43 = vpop.f32.mrf.mxu1 }
  0xd7   : > { %vm599_vm3 = vcmp.gt.f32.partialorder %v501_v2, 0.0  ;;  %v620_v4 = vmul.f32 %v1518_v62, %v501_v2  ;;  %v516_v5 = vadd.f32 %v1203_v3, %v1516_v60  ;;  %v641_v10 = vsel %vm600_vm2, %v506_v63, %v621_v1 }
  0xd8   : > { %v510_v6 = vpop.f32.mrf.mxu0  ;;  %v581_v52 = vadd.f32 %v1516_v60, %v580_v43  ;;  %vm616_vm14 = vcmp.gt.f32.partialorder %v586_v45, 0.0  ;;  %v1227_v56 = vpop.f32.mrf.mxu1  ;;  %v637_v0 = vmul.f32 %v1518_v62, %v586_v45 }
  0xd9   : > { %v623_v7 = vmul.f32 %v1518_v62, %v516_v5  ;;  %v511_v8 = vadd.f32 %v1516_v60, %v510_v6  ;;  %v640_v9 = vsel %vm599_vm3, %v501_v2, %v620_v4  ;;  %vm602_vm4 = vcmp.gt.f32.partialorder %v516_v5, 0.0 }
  0xda   : > { %v1206_v11 = vpop.f32.mrf.mxu0  ;;  %v660_v12 = vpack.c.bf16 %v641_v10, %v640_v9  ;;  %v636_v1 = vmul.f32 %v1518_v62, %v581_v52  ;;  %vm615_vm1 = vcmp.gt.f32.partialorder %v581_v52, 0.0  ;;  %v590_v6 = vpop.f32.mrf.mxu1 }
  0xdb   : > { %vm601_vm5 = vcmp.gt.f32.partialorder %v511_v8, 0.0  ;;  %v622_v13 = vmul.f32 %v1518_v62, %v511_v8  ;;  %v526_v14 = vadd.f32 %v1206_v11, %v1516_v60  ;;  %v643_v16 = vsel %vm602_vm4, %v516_v5, %v623_v7 }
  0xdc   : > { %v520_v15 = vpop.f32.mrf.mxu0  ;;  %1244 = vmatprep.mubr.bf16.mxu1 %v660_v12  ;;  %v656_v12 = vsel %vm615_vm1, %v581_v52, %v636_v1 }
  0xdd   : > { %v642_v17 = vsel %vm601_vm5, %v511_v8, %v622_v13  ;;  %v625_v18 = vmul.f32 %v1518_v62, %v526_v14  ;;  %v521_v19 = vadd.f32 %v1516_v60, %v520_v15  ;;  %vm604_vm6 = vcmp.gt.f32.partialorder %v526_v14, 0.0 }
  0xde   : > { %v661_v20 = vpack.c.bf16 %v643_v16, %v642_v17  ;;  %v1209_v21 = vpop.f32.mrf.mxu0  ;;  %v657_v13 = vsel %vm616_vm14, %v586_v45, %v637_v0  ;;  %v596_v15 = vadd.f32 %v1227_v56, %v1516_v60  ;;  %v591_v16 = vadd.f32 %v1516_v60, %v590_v6 }
  0xdf   : > { %vm603_vm7 = vcmp.gt.f32.partialorder %v521_v19, 0.0  ;;  %v624_v22 = vmul.f32 %v1518_v62, %v521_v19  ;;  %v536_v23 = vadd.f32 %v1209_v21, %v1516_v60  ;;  %v645_v28 = vsel %vm604_vm6, %v526_v14, %v625_v18 }
  0xe0   : > { %v530_v24 = vpop.f32.mrf.mxu0  ;;  %1245 = vmatmul.mubr.bf16.vlgmr.msra.gmra.mxu1 %v661_v20  ;;  %v639_v21 = vmul.f32 %v1518_v62, %v596_v15  ;;  %vm618_vm4 = vcmp.gt.f32.partialorder %v596_v15, 0.0  ;;  %vm617_vm5 = vcmp.gt.f32.partialorder %v591_v16, 0.0 }
  0xe1   : > { %v627_v25 = vmul.f32 %v1518_v62, %v536_v23  ;;  %v531_v26 = vadd.f32 %v1516_v60, %v530_v24  ;;  %v644_v27 = vsel %vm603_vm7, %v521_v19, %v624_v22  ;;  %vm606_vm8 = vcmp.gt.f32.partialorder %v536_v23, 0.0 }
  0xe2   : > { %v1212_v29 = vpop.f32.mrf.mxu0  ;;  %v662_v30 = vpack.c.bf16 %v645_v28, %v644_v27  ;;  %v668_v19 = vpack.c.bf16 %v657_v13, %v656_v12  ;;  %v638_v22 = vmul.f32 %v1518_v62, %v591_v16  ;;  %v659_v24 = vsel %vm618_vm4, %v596_v15, %v639_v21  ;;  %v888_v28 = vld [vmem:[%s1684_s5 + $0x18] sm:$0xff] }
  0xe3   : > { %vm605_vm9 = vcmp.gt.f32.partialorder %v531_v26, 0.0  ;;  %v626_v31 = vmul.f32 %v1518_v62, %v531_v26  ;;  %v546_v32 = vadd.f32 %v1212_v29, %v1516_v60  ;;  %v647_v38 = vsel %vm606_vm8, %v536_v23, %v627_v25 }
  0xe4   : > { %v540_v34 = vpop.f32.mrf.mxu0  ;;  %1248 = vmatprep.mubr.bf16.mxu1 %v662_v30  ;;  %v658_v23 = vsel %vm617_vm5, %v591_v16, %v638_v22  ;;  %v885_v30 = vld [vmem:[%s1684_s5] sm:$0xff] }
  0xe5   : > { %v629_v35 = vmul.f32 %v1518_v62, %v546_v32  ;;  %v541_v36 = vadd.f32 %v1516_v60, %v540_v34  ;;  %v646_v37 = vsel %vm605_vm9, %v531_v26, %v626_v31  ;;  %vm608_vm10 = vcmp.gt.f32.partialorder %v546_v32, 0.0  ;;  %v890_v26 = vld [vmem:[%s1684_s5 + $0x28] sm:$0xff]  ;;  %v1582_v34 = vld [vmem:[%s1683_s4] ss:$0 sm:$0xff] }
  0xe6   : > { %v1215_v39 = vpop.f32.mrf.mxu0  ;;  %v663_v40 = vpack.c.bf16 %v647_v38, %v646_v37  ;;  %v669_v25 = vpack.c.bf16 %v659_v24, %v658_v23  ;;  %v886_v31 = vld [vmem:[%s1684_s5 + $0x8] sm:$0xff] }
  0xe7   : > { %vm607_vm11 = vcmp.gt.f32.partialorder %v541_v36, 0.0  ;;  %v628_v41 = vmul.f32 %v1518_v62, %v541_v36  ;;  %v556_v42 = vadd.f32 %v1215_v39, %v1516_v60  ;;  %v649_v49 = vsel %vm608_vm10, %v546_v32, %v629_v35 }
  0xe8   : > { %v550_v44 = vpop.f32.mrf.mxu0  ;;  %1249 = vmatmul.mubr.bf16.gmra.mxu1 %v663_v40  ;;  %v901_v32 = vpack.c.bf16 %v886_v31, %v885_v30  ;;  %v1586_v39 = vstv %s340_s28 }
  0xe9   : > { %v631_v46 = vmul.f32 %v1518_v62, %v556_v42  ;;  %v551_v47 = vadd.f32 %v1516_v60, %v550_v44  ;;  %v648_v48 = vsel %vm607_vm11, %v541_v36, %v628_v41  ;;  %vm610_vm12 = vcmp.gt.f32.partialorder %v556_v42, 0.0 }
  0xea   : > { %v1218_v50 = vpop.f32.mrf.mxu0  ;;  %v664_v51 = vpack.c.bf16 %v649_v49, %v648_v48 }
  0xeb   : > { %vm609_vm13 = vcmp.gt.f32.partialorder %v551_v47, 0.0  ;;  %v630_v53 = vmul.f32 %v1518_v62, %v551_v47  ;;  %v566_v54 = vadd.f32 %v1218_v50, %v1516_v60  ;;  %v651_v61 = vsel %vm610_vm12, %v556_v42, %v631_v46 }
  0xec   : > { %v560_v55 = vpop.f32.mrf.mxu0  ;;  %1252 = vmatprep.mubr.bf16.mxu1 %v664_v51 }
  0xed   : > { %v633_v57 = vmul.f32 %v1518_v62, %v566_v54  ;;  %v561_v58 = vadd.f32 %v1516_v60, %v560_v55  ;;  %v650_v59 = vsel %vm609_vm13, %v551_v47, %v630_v53  ;;  %vm612_vm15 = vcmp.gt.f32.partialorder %v566_v54, 0.0 }
  0xee   : > { %v1221_v63 = vpop.f32.mrf.mxu0  ;;  %v665_v2 = vpack.c.bf16 %v651_v61, %v650_v59 }
  0xef   : > { %vm611_vm0 = vcmp.gt.f32.partialorder %v561_v58, 0.0  ;;  %v632_v3 = vmul.f32 %v1518_v62, %v561_v58  ;;  %v576_v4 = vadd.f32 %v1221_v63, %v1516_v60  ;;  %v653_v10 = vsel %vm612_vm15, %v566_v54, %v633_v57 }
  0xf0   : > { %v570_v5 = vpop.f32.mrf.mxu0  ;;  %1253 = vmatmul.mubr.bf16.gmra.mxu1 %v665_v2 }
  0xf1   : > { %v635_v7 = vmul.f32 %v1518_v62, %v576_v4  ;;  %v571_v8 = vadd.f32 %v1516_v60, %v570_v5  ;;  %v652_v9 = vsel %vm611_vm0, %v561_v58, %v632_v3  ;;  %vm614_vm2 = vcmp.gt.f32.partialorder %v576_v4, 0.0  ;;  %v889_v60 = vld [vmem:[%s1684_s5 + $0x20] sm:$0xff] }
  0xf2   : > { %v666_v11 = vpack.c.bf16 %v653_v10, %v652_v9  ;;  %v903_v27 = vpack.c.bf16 %v890_v26, %v889_v60 }
  0xf3   : > { %vm613_vm3 = vcmp.gt.f32.partialorder %v571_v8, 0.0  ;;  %v634_v14 = vmul.f32 %v1518_v62, %v571_v8  ;;  %v655_v18 = vsel %vm614_vm2, %v576_v4, %v635_v7  ;;  %v887_v62 = vld [vmem:[%s1684_s5 + $0x10] sm:$0xff] }
  0xf4   : > { %1256 = vmatprep.mubr.bf16.mxu1 %v666_v11  ;;  %1274 = vmatprep.subr.bf16.mxu0 %v903_v27  ;;  %v902_v29 = vpack.c.bf16 %v888_v28, %v887_v62 }
  0xf5   : > { %v654_v17 = vsel %vm613_vm3, %v571_v8, %v634_v14  ;;  %1275 = vmatpush3.bf16.msra.mxu0 %v903_v27 }
  0xf6   : > { %v667_v20 = vpack.c.bf16 %v655_v18, %v654_v17  ;;  %1276 = vmatprep.subr.bf16.mxu0 %v902_v29 }
  0xf8   : > { %1257 = vmatmul.mubr.bf16.gmra.mxu1 %v667_v20 }
  0xf9   : > { %1260 = vmatprep.mubr.bf16.mxu1 %v668_v19  ;;  %1277 = vmatpush3.bf16.msra.mxu0 %v902_v29 }
  0xfa   : > { %1278 = vmatprep.subr.bf16.mxu0 %v901_v32 }
  0xfd   : > { %1279 = vmatpush3.bf16.msra.mxu0 %v901_v32 }
 0x100   : > { %1261 = vmatmul.mubr.bf16.gmra.mxu1 %v669_v25 }
 0x1a0   : > { %v1246_v33 = vpop.f32.mrf.mxu1 }
 0x1a1   : > { %v744_v37 = vadd.f32 %v1246_v33, %v1582_v34 }
 0x1a2   : > { %v735_v35 = vpop.f32.mrf.mxu1 }
 0x1a3   : > { %v736_v36 = vadd.f32 %v1582_v34, %v735_v35  ;;  %v837_v45 = vmul.f32 %v1586_v39, %v744_v37  ;;  %vm816_vm8 = vcmp.gt.f32.partialorder %v744_v37, 0.0 }
 0x1a4   : > { %v1247_v38 = vpop.f32.mrf.mxu1 }
 0x1a5   : > { %v747_v40 = vadd.f32 %v1247_v38, %v1582_v34  ;;  %v835_v42 = vmul.f32 %v1586_v39, %v736_v36  ;;  %vm814_vm7 = vcmp.gt.f32.partialorder %v736_v36, 0.0  ;;  %v857_v53 = vsel %vm816_vm8, %v744_v37, %v837_v45 }
 0x1a6   : > { %v738_v41 = vpop.f32.mrf.mxu1 }
 0x1a7   : > { %vm817_vm6 = vcmp.gt.f32.partialorder %v747_v40, 0.0  ;;  %v838_v43 = vmul.f32 %v1586_v39, %v747_v40  ;;  %v739_v44 = vadd.f32 %v1582_v34, %v738_v41  ;;  %v855_v51 = vsel %vm814_vm7, %v736_v36, %v835_v42 }
 0x1a8   : > { %v1250_v46 = vpop.f32.mrf.mxu1 }
 0x1a9   : > { %vm815_vm9 = vcmp.gt.f32.partialorder %v739_v44, 0.0  ;;  %v836_v47 = vmul.f32 %v1586_v39, %v739_v44  ;;  %v858_v48 = vsel %vm817_vm6, %v747_v40, %v838_v43  ;;  %v760_v54 = vadd.f32 %v1250_v46, %v1582_v34 }
 0x1aa   : > { %v751_v49 = vpop.f32.mrf.mxu1  ;;  %v876_v57 = vpack.c.bf16 %v858_v48, %v857_v53 }
 0x1ab   : > { %v752_v50 = vadd.f32 %v1582_v34, %v751_v49  ;;  %v856_v52 = vsel %vm815_vm9, %v739_v44, %v836_v47  ;;  %v841_v1 = vmul.f32 %v1586_v39, %v760_v54  ;;  %vm820_vm12 = vcmp.gt.f32.partialorder %v760_v54, 0.0 }
 0x1ac   : > { %v1251_v55 = vpop.f32.mrf.mxu1  ;;  %v875_v56 = vpack.c.bf16 %v856_v52, %v855_v51 }
 0x1ad   : > { %v763_v58 = vadd.f32 %v1251_v55, %v1582_v34  ;;  %v839_v61 = vmul.f32 %v1586_v39, %v752_v50  ;;  %vm818_vm11 = vcmp.gt.f32.partialorder %v752_v50, 0.0  ;;  %v861_v12 = vsel %vm820_vm12, %v760_v54, %v841_v1 }
 0x1ae   : > { %v754_v59 = vpop.f32.mrf.mxu1  ;;  %1280 = vmatprep.mubr.bf16.mxu0 %v875_v56 }
 0x1af   : > { %vm821_vm10 = vcmp.gt.f32.partialorder %v763_v58, 0.0  ;;  %v842_v63 = vmul.f32 %v1586_v39, %v763_v58  ;;  %v755_v0 = vadd.f32 %v1582_v34, %v754_v59  ;;  %1281 = vmatmul.mubr.bf16.vlgmr.msra.gmra.mxu0 %v876_v57  ;;  %v859_v7 = vsel %vm818_vm11, %v752_v50, %v839_v61 }
 0x1b0   : > { %v1254_v2 = vpop.f32.mrf.mxu1 }
 0x1b1   : > { %vm819_vm13 = vcmp.gt.f32.partialorder %v755_v0, 0.0  ;;  %v840_v3 = vmul.f32 %v1586_v39, %v755_v0  ;;  %v862_v5 = vsel %vm821_vm10, %v763_v58, %v842_v63  ;;  %v776_v9 = vadd.f32 %v1254_v2, %v1582_v34 }
 0x1b2   : > { %v767_v4 = vpop.f32.mrf.mxu1  ;;  %v878_v14 = vpack.c.bf16 %v862_v5, %v861_v12  ;;  %vm1029_vm10 = vcmask 64512  }
 0x1b3   : > { %v768_v6 = vadd.f32 %v1582_v34, %v767_v4  ;;  %v860_v8 = vsel %vm819_vm13, %v755_v0, %v840_v3  ;;  %v845_v19 = vmul.f32 %v1586_v39, %v776_v9  ;;  %vm824_vm0 = vcmp.gt.f32.partialorder %v776_v9, 0.0 }
 0x1b4   : > { %v1255_v10 = vpop.f32.mrf.mxu1  ;;  %v877_v11 = vpack.c.bf16 %v860_v8, %v859_v7 }
 0x1b5   : > { %v779_v13 = vadd.f32 %v1255_v10, %v1582_v34  ;;  %v843_v16 = vmul.f32 %v1586_v39, %v768_v6  ;;  %vm822_vm15 = vcmp.gt.f32.partialorder %v768_v6, 0.0  ;;  %v865_v28 = vsel %vm824_vm0, %v776_v9, %v845_v19 }
 0x1b6   : > { %v770_v15 = vpop.f32.mrf.mxu1  ;;  %1284 = vmatprep.mubr.bf16.mxu0 %v877_v11 }
 0x1b7   : > { %vm825_vm14 = vcmp.gt.f32.partialorder %v779_v13, 0.0  ;;  %v846_v17 = vmul.f32 %v1586_v39, %v779_v13  ;;  %v771_v18 = vadd.f32 %v1582_v34, %v770_v15  ;;  %1285 = vmatmul.mubr.bf16.gmra.mxu0 %v878_v14  ;;  %v863_v25 = vsel %vm822_vm15, %v768_v6, %v843_v16 }
 0x1b8   : > { %v1258_v20 = vpop.f32.mrf.mxu1 }
 0x1b9   : > { %vm823_vm1 = vcmp.gt.f32.partialorder %v771_v18, 0.0  ;;  %v844_v21 = vmul.f32 %v1586_v39, %v771_v18  ;;  %v866_v23 = vsel %vm825_vm14, %v779_v13, %v846_v17  ;;  %v792_v26 = vadd.f32 %v1258_v20, %v1582_v34 }
 0x1ba   : > { %v783_v22 = vpop.f32.mrf.mxu1  ;;  %v880_v30 = vpack.c.bf16 %v866_v23, %v865_v28 }
 0x1bb   : > { %v784_v24 = vadd.f32 %v1582_v34, %v783_v22  ;;  %v864_v60 = vsel %vm823_vm1, %v771_v18, %v844_v21  ;;  %v849_v36 = vmul.f32 %v1586_v39, %v792_v26  ;;  %vm828_vm4 = vcmp.gt.f32.partialorder %v792_v26, 0.0 }
 0x1bc   : > { %v1259_v27 = vpop.f32.mrf.mxu1  ;;  %v879_v62 = vpack.c.bf16 %v864_v60, %v863_v25 }
 0x1bd   : > { %v795_v29 = vadd.f32 %v1259_v27, %v1582_v34  ;;  %v847_v32 = vmul.f32 %v1586_v39, %v784_v24  ;;  %vm826_vm3 = vcmp.gt.f32.partialorder %v784_v24, 0.0  ;;  %v869_v48 = vsel %vm828_vm4, %v792_v26, %v849_v36 }
 0x1be   : > { %v786_v31 = vpop.f32.mrf.mxu1  ;;  %1288 = vmatprep.mubr.bf16.mxu0 %v879_v62 }
 0x1bf   : > { %vm829_vm2 = vcmp.gt.f32.partialorder %v795_v29, 0.0  ;;  %v850_v33 = vmul.f32 %v1586_v39, %v795_v29  ;;  %v787_v35 = vadd.f32 %v1582_v34, %v786_v31  ;;  %1289 = vmatmul.mubr.bf16.gmra.mxu0 %v880_v30  ;;  %v867_v43 = vsel %vm826_vm3, %v784_v24, %v847_v32 }
 0x1c0   : > { %v1262_v37 = vpop.f32.mrf.mxu1 }
 0x1c1   : > { %vm827_vm5 = vcmp.gt.f32.partialorder %v787_v35, 0.0  ;;  %v848_v38 = vmul.f32 %v1586_v39, %v787_v35  ;;  %v870_v41 = vsel %vm829_vm2, %v795_v29, %v850_v33  ;;  %v808_v45 = vadd.f32 %v1262_v37, %v1582_v34 }
 0x1c2   : > { %v799_v40 = vpop.f32.mrf.mxu1  ;;  %v882_v50 = vpack.c.bf16 %v870_v41, %v869_v48 }
 0x1c3   : > { %v800_v42 = vadd.f32 %v1582_v34, %v799_v40  ;;  %v868_v44 = vsel %vm827_vm5, %v787_v35, %v848_v38  ;;  %v853_v55 = vmul.f32 %v1586_v39, %v808_v45  ;;  %vm832_vm8 = vcmp.gt.f32.partialorder %v808_v45, 0.0 }
 0x1c4   : > { %v1263_v46 = vpop.f32.mrf.mxu1  ;;  %v881_v47 = vpack.c.bf16 %v868_v44, %v867_v43 }
 0x1c5   : > { %v811_v49 = vadd.f32 %v1263_v46, %v1582_v34  ;;  %v851_v52 = vmul.f32 %v1586_v39, %v800_v42  ;;  %vm830_vm7 = vcmp.gt.f32.partialorder %v800_v42, 0.0  ;;  %v873_v63 = vsel %vm832_vm8, %v808_v45, %v853_v55 }
 0x1c6   : > { %v802_v51 = vpop.f32.mrf.mxu1  ;;  %1292 = vmatprep.mubr.bf16.mxu0 %v881_v47 }
 0x1c7   : > { %vm833_vm6 = vcmp.gt.f32.partialorder %v811_v49, 0.0  ;;  %v854_v53 = vmul.f32 %v1586_v39, %v811_v49  ;;  %v803_v54 = vadd.f32 %v1582_v34, %v802_v51  ;;  %1293 = vmatmul.mubr.bf16.gmra.mxu0 %v882_v50  ;;  %v871_v58 = vsel %vm830_vm7, %v800_v42, %v851_v52  ;;  %v1136_v34 = vld [vmem:[%s1685_s6] ss:$0 sm:$0xff] }
 0x1c9   : > { %vm831_vm9 = vcmp.gt.f32.partialorder %v803_v54, 0.0  ;;  %v852_v56 = vmul.f32 %v1586_v39, %v803_v54  ;;  %v874_v57 = vsel %vm833_vm6, %v811_v49, %v854_v53 }
 0x1ca   : > { %v884_v0 = vpack.c.bf16 %v874_v57, %v873_v63 }
 0x1cb   : > { %v872_v59 = vsel %vm831_vm9, %v803_v54, %v852_v56 }
 0x1cc   : > { %v883_v61 = vpack.c.bf16 %v872_v59, %v871_v58 }
 0x1ce   : > { %1296 = vmatprep.mubr.bf16.mxu0 %v883_v61 }
 0x1cf   : > { %1297 = vmatmul.mubr.bf16.gmra.mxu0 %v884_v0 }
 0x26f   : > { %v1282_v39 = vpop.f32.mrf.mxu0 }
 0x270   : > { %v959_v1 = vadd.f32 %v1282_v39, %v1136_v34 }
 0x271   : > { %v950_v2 = vpop.f32.mrf.mxu0 }
 0x272   : > { %1032 = vst.msk [vmem:[%s1634_s14 + $0x10] sm:$0xff] %vm1029_vm10, %v959_v1  ;;  %v951_v3 = vadd.f32 %v1136_v34, %v950_v2 }
 0x273   : > { %v1283_v4 = vpop.f32.mrf.mxu0 }
 0x274   : > { %1030 = vst.msk [vmem:[%s1634_s14] sm:$0xff] %vm1029_vm10, %v951_v3  ;;  %v962_v5 = vadd.f32 %v1283_v4, %v1136_v34 }
 0x275   : > { %v953_v6 = vpop.f32.mrf.mxu0 }
 0x276   : > { %1033 = vst.msk [vmem:[%s1634_s14 + $0x18] sm:$0xff] %vm1029_vm10, %v962_v5  ;;  %v954_v7 = vadd.f32 %v1136_v34, %v953_v6 }
 0x277   : > { %v1286_v8 = vpop.f32.mrf.mxu0 }
 0x278   : > { %1031 = vst.msk [vmem:[%s1634_s14 + $0x8] sm:$0xff] %vm1029_vm10, %v954_v7  ;;  %v975_v9 = vadd.f32 %v1286_v8, %v1136_v34 }
 0x279   : > { %v966_v10 = vpop.f32.mrf.mxu0 }
 0x27a   : > { %1036 = vst.msk [vmem:[%s1634_s14 + $0x30] sm:$0xff] %vm1029_vm10, %v975_v9  ;;  %v967_v11 = vadd.f32 %v1136_v34, %v966_v10 }
 0x27b   : > { %v1287_v12 = vpop.f32.mrf.mxu0 }
 0x27c   : > { %1034 = vst.msk [vmem:[%s1634_s14 + $0x20] sm:$0xff] %vm1029_vm10, %v967_v11  ;;  %v978_v13 = vadd.f32 %v1287_v12, %v1136_v34 }
 0x27d   : > { %v969_v14 = vpop.f32.mrf.mxu0 }
 0x27e   : > { %1037 = vst.msk [vmem:[%s1634_s14 + $0x38] sm:$0xff] %vm1029_vm10, %v978_v13  ;;  %v970_v15 = vadd.f32 %v1136_v34, %v969_v14 }
 0x27f   : > { %v1290_v16 = vpop.f32.mrf.mxu0 }
 0x280   : > { %1035 = vst.msk [vmem:[%s1634_s14 + $0x28] sm:$0xff] %vm1029_vm10, %v970_v15  ;;  %v991_v17 = vadd.f32 %v1290_v16, %v1136_v34 }
 0x281   : > { %v982_v18 = vpop.f32.mrf.mxu0 }
 0x282   : > { %1040 = vst.msk [vmem:[%s1634_s14 + $0x50] sm:$0xff] %vm1029_vm10, %v991_v17  ;;  %v983_v19 = vadd.f32 %v1136_v34, %v982_v18 }
 0x283   : > { %v1291_v20 = vpop.f32.mrf.mxu0 }
 0x284   : > { %1038 = vst.msk [vmem:[%s1634_s14 + $0x40] sm:$0xff] %vm1029_vm10, %v983_v19  ;;  %v994_v21 = vadd.f32 %v1291_v20, %v1136_v34 }
 0x285   : > { %v985_v22 = vpop.f32.mrf.mxu0 }
 0x286   : > { %1041 = vst.msk [vmem:[%s1634_s14 + $0x58] sm:$0xff] %vm1029_vm10, %v994_v21  ;;  %v986_v23 = vadd.f32 %v1136_v34, %v985_v22 }
 0x287   : > { %v1294_v24 = vpop.f32.mrf.mxu0 }
 0x288   : > { %1039 = vst.msk [vmem:[%s1634_s14 + $0x48] sm:$0xff] %vm1029_vm10, %v986_v23  ;;  %v1007_v25 = vadd.f32 %v1294_v24, %v1136_v34 }
 0x289   : > { %v998_v60 = vpop.f32.mrf.mxu0 }
 0x28a   : > { %1044 = vst.msk [vmem:[%s1634_s14 + $0x70] sm:$0xff] %vm1029_vm10, %v1007_v25  ;;  %v999_v26 = vadd.f32 %v1136_v34, %v998_v60 }
 0x28b   : > { %v1295_v27 = vpop.f32.mrf.mxu0 }
 0x28c   : > { %1042 = vst.msk [vmem:[%s1634_s14 + $0x60] sm:$0xff] %vm1029_vm10, %v999_v26  ;;  %v1010_v62 = vadd.f32 %v1295_v27, %v1136_v34 }
 0x28d   : > { %v1001_v28 = vpop.f32.mrf.mxu0 }
 0x28e   : > { %1045 = vst.msk [vmem:[%s1634_s14 + $0x78] sm:$0xff] %vm1029_vm10, %v1010_v62  ;;  %v1002_v29 = vadd.f32 %v1136_v34, %v1001_v28 }
 0x28f   : > { %v1298_v30 = vpop.f32.mrf.mxu0 }
 0x290   : > { %1043 = vst.msk [vmem:[%s1634_s14 + $0x68] sm:$0xff] %vm1029_vm10, %v1002_v29  ;;  %v1023_v31 = vadd.f32 %v1298_v30, %v1136_v34 }
 0x291   : > { %v1014_v32 = vpop.f32.mrf.mxu0 }
 0x292   : > { %1048 = vst.msk [vmem:[%s1634_s14 + $0x90] sm:$0xff] %vm1029_vm10, %v1023_v31  ;;  %v1015_v33 = vadd.f32 %v1136_v34, %v1014_v32 }
 0x293   : > { %v1299_v35 = vpop.f32.mrf.mxu0 }
 0x294   : > { %1046 = vst.msk [vmem:[%s1634_s14 + $0x80] sm:$0xff] %vm1029_vm10, %v1015_v33  ;;  %v1026_v36 = vadd.f32 %v1299_v35, %v1136_v34 }
 0x295   : > { %v1017_v37 = vpop.f32.mrf.mxu0 }
 0x296   : > { %1049 = vst.msk [vmem:[%s1634_s14 + $0x98] sm:$0xff] %vm1029_vm10, %v1026_v36  ;;  %v1018_v38 = vadd.f32 %v1136_v34, %v1017_v37 }
 0x298   : > { %1047 = vst.msk [vmem:[%s1634_s14 + $0x88] sm:$0xff] %vm1029_vm10, %v1018_v38 }
 0x299 PF: > { %s21_s13 = sadd.s32 1, %s1316_s13  }
 0x29a   : > { %p18_p4 = scmp.ge.s32.totalorder %s21_s13, 4  }
 0x29c   :  { %20 = sbr.rel (!%p18_p4) target bundleno = 3 (0x3), region = 86 }

</bundles_post_ra>
